<compile_context>
chip_gen: v7x
topology: tpu7x:2x2x1
jax: 0.10.0
libtpu: 0.0.40
codegen_flags: <defaults>
</compile_context>

<pallas_src>
import functools
import math

import jax
import jax.numpy as jnp
from jax import lax
from jax.experimental import pallas as pl
from jax.experimental.pallas import tpu as pltpu

_LOG_2PI = math.log(2.0 * math.pi)
_LANES = 128


def _cdiv(a: int, b: int) -> int:
    return -(-a // b)


def _round_up(x: int, m: int) -> int:
    return _cdiv(x, m) * m


def _gmm_partial_kernel(x_ref, c_ref, a_ref, mu_ref, out_ref, *,
                        n_components, tile_rows, valid_in_last, mask_needed):
    """One grid step: per-lane partial sum of log_prob over a (tile_rows, 128) tile.

    x_ref  : VMEM (tile_rows, 128) f32   sample tile
    c_ref  : SMEM (K,)             f32   precomputed c_k = log_mix_k - ls_k - 0.5*log(2*pi)
    a_ref  : SMEM (K,)             f32   precomputed a_k = -0.5 * exp(-2*ls_k)
    mu_ref : SMEM (K,)             f32   component means
    out_ref: VMEM (1, 1, 128)      f32   per-lane partial sums for this tile
    """
    i = pl.program_id(0)
    x = x_ref[...]  # (tile_rows, 128)

    # lp_k(x) = c_k + a_k * (x - mu_k)^2   (constants precomputed in wrapper)
    def comp_lp(k):
        d = x - mu_ref[k]
        return c_ref[k] + a_ref[k] * (d * d)

    # ---- elementwise mixture log-prob -------------------------------------
    if n_components == 1:
        log_prob = comp_lp(0)
    elif n_components == 2:
        # Single-exp logaddexp: 1 exp + 1 log1p per element on the EUP.
        lp0 = comp_lp(0)
        lp1 = comp_lp(1)
        m = jnp.maximum(lp0, lp1)
        log_prob = m + jnp.log1p(jnp.exp(-jnp.abs(lp0 - lp1)))
    elif n_components <= 4:
        # Cache the lp_k from the max pass (K live tile temporaries) to avoid
        # VALU recompute in the sum pass; fine for small K at these tile sizes.
        lps = [comp_lp(k) for k in range(n_components)]
        m = lps[0]
        for k in range(1, n_components):
            m = jnp.maximum(m, lps[k])
        s = jnp.exp(lps[0] - m)
        for k in range(1, n_components):
            s = s + jnp.exp(lps[k] - m)
        log_prob = m + jnp.log(s)
    else:
        # General K: two-pass running max + running sum, recomputing lp_k to
        # keep only two live full-tile temporaries.
        m = comp_lp(0)
        for k in range(1, n_components):
            m = jnp.maximum(m, comp_lp(k))
        s = jnp.exp(comp_lp(0) - m)
        for k in range(1, n_components):
            s = s + jnp.exp(comp_lp(k) - m)
        log_prob = m + jnp.log(s)

    # ---- per-tile sublane reduce; padding handled only on the last tile ---
    if mask_needed:
        last = pl.num_programs(0) - 1

        @pl.when(i != last)
        def _():
            out_ref[...] = jnp.sum(log_prob, axis=0).reshape(1, 1, _LANES)

        @pl.when(i == last)
        def _():
            # Tile-local index: bounded by tile_rows*128, no int32 overflow.
            row = lax.broadcasted_iota(jnp.int32, (tile_rows, _LANES), 0)
            lane = lax.broadcasted_iota(jnp.int32, (tile_rows, _LANES), 1)
            local_idx = row * _LANES + lane
            lp = jnp.where(local_idx < valid_in_last, log_prob, 0.0)
            out_ref[...] = jnp.sum(lp, axis=0).reshape(1, 1, _LANES)
    else:
        out_ref[...] = jnp.sum(log_prob, axis=0).reshape(1, 1, _LANES)


def gmm_forward(x, logweights, means, logstdevs, *, tile_rows=2048):
    """Equivalent of GaussianMixtureModel.forward(x): -mean(gmm.log_prob(x))."""
    x = jnp.asarray(x, jnp.float32).reshape(-1)
    n = int(x.shape[0])
    n_components = int(logweights.shape[0])

    logweights = jnp.asarray(logweights, jnp.float32)
    means = jnp.asarray(means, jnp.float32)
    logstdevs = jnp.asarray(logstdevs, jnp.float32)

    # Hoisted per-component constants (computed once, outside the grid):
    #   lp_k(x) = c_k + a_k * (x - mu_k)^2
    log_norm = jax.scipy.special.logsumexp(logweights)
    c = (logweights - log_norm) - logstdevs - 0.5 * _LOG_2PI
    a = -0.5 * jnp.exp(-2.0 * logstdevs)

    rows = _cdiv(n, _LANES)
    rows8 = _round_up(rows, 8)
    # Tile rows: multiple of 8 (f32 sublane tiling); avoid over-padding small N.
    tr = max(8, min(int(tile_rows), rows8))
    tr = _round_up(tr, 8)
    # Prefer >= 2 grid steps when there is enough data so a megacore (v7x) can
    # split the "parallel" reduction axis across its two TensorCores.
    if rows8 > 8 and _cdiv(rows, tr) < 2:
        tr = max(8, _round_up(_cdiv(rows, 2), 8))

    rows_padded = _round_up(rows, tr)
    n_padded = rows_padded * _LANES
    if n_padded != n:
        x = jnp.pad(x, (0, n_padded - n))
    x2d = x.reshape(rows_padded, _LANES)
    num_tiles = rows_padded // tr
    valid_in_last = n - (num_tiles - 1) * tr * _LANES  # static, <= tr*128

    kernel = functools.partial(
        _gmm_partial_kernel,
        n_components=n_components,
        tile_rows=tr,
        valid_in_last=valid_in_last,
        mask_needed=(n_padded != n),
    )

    partials = pl.pallas_call(
        kernel,
        out_shape=jax.ShapeDtypeStruct((num_tiles, 1, _LANES), jnp.float32),
        grid_spec=pltpu.PrefetchScalarGridSpec(
            num_scalar_prefetch=0,
            grid=(num_tiles,),
            in_specs=[
                pl.BlockSpec((tr, _LANES), lambda i: (i, 0)),             # x tile (VMEM)
                pl.BlockSpec(memory_space=pltpu.MemorySpace.SMEM),        # c_k
                pl.BlockSpec(memory_space=pltpu.MemorySpace.SMEM),        # a_k
                pl.BlockSpec(memory_space=pltpu.MemorySpace.SMEM),        # mu_k
            ],
            out_specs=pl.BlockSpec((1, 1, _LANES), lambda i: (i, 0, 0)),
        ),
        compiler_params=pltpu.CompilerParams(
            dimension_semantics=("parallel",),
        ),
    )(x2d, c, a, means)

    # Tiny final reduction + single divide/negate, outside the grid.
    return -jnp.sum(partials) / jnp.float32(n)


def _reference_forward(x, logweights, means, logstdevs):
    """Pure-JAX reference matching torch.distributions.MixtureSameFamily semantics."""
    x = jnp.asarray(x, jnp.float32).reshape(-1)
    logweights = jnp.asarray(logweights, jnp.float32)
    means = jnp.asarray(means, jnp.float32)
    logstdevs = jnp.asarray(logstdevs, jnp.float32)
    log_mix = logweights - jax.scipy.special.logsumexp(logweights)
    stds = jnp.exp(logstdevs)
    z = (x[:, None] - means[None, :]) / stds[None, :]
    comp_lp = -0.5 * z * z - logstdevs[None, :] - 0.5 * _LOG_2PI
    log_prob = jax.scipy.special.logsumexp(comp_lp + log_mix[None, :], axis=-1)
    return -jnp.mean(log_prob)


if __name__ == "__main__":
    keys = jax.random.split(jax.random.PRNGKey(0), 10)

    # ---- case 1: module defaults (K=2), N not a multiple of 128 -----------
    n_components = 2
    mmin, mmax = 7.0, 13.0
    logweights = jnp.zeros((n_components,), dtype=jnp.float32)
    means = (mmax - mmin) * jax.random.uniform(keys[0], (n_components,)) + mmin
    logstdevs = 0.1 * jax.random.uniform(keys[1], (n_components,)) - 1.0
    x = 6.0 * jax.random.uniform(keys[2], (4099,)) + 7.0

    # Small tiles -> exercises the multi-step grid + last-tile mask branch.
    nll_grid = jax.block_until_ready(
        gmm_forward(x, logweights, means, logstdevs, tile_rows=8))
    # Default tiling (clamped + split for small N) -> 2-tile path.
    nll_default = jax.block_until_ready(
        gmm_forward(x, logweights, means, logstdevs))
    ref = _reference_forward(x, logweights, means, logstdevs)
    assert jnp.allclose(nll_grid, ref, rtol=1e-4, atol=1e-4), (nll_grid, ref)
    assert jnp.allclose(nll_default, ref, rtol=1e-4, atol=1e-4), (nll_default, ref)

    # ---- case 2: general-K cached-lp path (K=3), tiny N --------------------
    n_components3 = 3
    logweights3 = 0.5 * jax.random.uniform(keys[3], (n_components3,))
    means3 = 6.0 * jax.random.uniform(keys[4], (n_components3,)) + 7.0
    logstdevs3 = 0.1 * jax.random.uniform(keys[5], (n_components3,)) - 1.0
    x3 = 6.0 * jax.random.uniform(keys[6], (1000,)) + 7.0

    nll3 = jax.block_until_ready(gmm_forward(x3, logweights3, means3, logstdevs3))
    ref3 = _reference_forward(x3, logweights3, means3, logstdevs3)
    assert jnp.allclose(nll3, ref3, rtol=1e-4, atol=1e-4), (nll3, ref3)

    # ---- case 3: medium N (K=2) -> multiple default-sized tiles + padding --
    x4 = 6.0 * jax.random.uniform(keys[7], (70001,)) + 7.0
    nll4 = jax.block_until_ready(gmm_forward(x4, logweights, means, logstdevs))
    ref4 = _reference_forward(x4, logweights, means, logstdevs)
    assert jnp.allclose(nll4, ref4, rtol=1e-4, atol=1e-4), (nll4, ref4)

    print("KERNEL_OK")
</pallas_src>

<mosaic_0001>
module attributes {stable_mosaic.version = 11 : i64} {
  func.func @_gmm_partial_kernel(%arg0: i32, %arg1: memref<8x128xf32, #tpu.memory_space<vmem>>, %arg2: memref<2xf32, #tpu.memory_space<smem>>, %arg3: memref<2xf32, #tpu.memory_space<smem>>, %arg4: memref<2xf32, #tpu.memory_space<smem>>, %arg5: memref<1x1x128xf32, #tpu.memory_space<vmem>>) attributes {dimension_semantics = [#tpu.dimension_semantics<parallel>], iteration_bounds = array<i64: 5>, scalar_prefetch = 0 : i64, scratch_operands = 0 : i64, tpu.core_type = #tpu.core_type<tc>, window_params = [{transform_indices = @transform_0, window_bounds = array<i64: 8, 128>}, {transform_indices = @transform_1, window_bounds = array<i64: 2>}, {transform_indices = @transform_2, window_bounds = array<i64: 2>}, {transform_indices = @transform_3, window_bounds = array<i64: 2>}, {transform_indices = @transform_4, window_bounds = array<i64: 1, 1, 128>}]} {
    %c0 = arith.constant 0 : index
    %c0_0 = arith.constant 0 : index
    %0 = vector.load %arg1[%c0, %c0_0] : memref<8x128xf32, #tpu.memory_space<vmem>>, vector<8x128xf32>
    %c0_1 = arith.constant 0 : index
    %1 = memref.load %arg4[%c0_1] : memref<2xf32, #tpu.memory_space<smem>>
    %2 = vector.broadcast %1 : f32 to vector<8x128xf32>
    %3 = arith.subf %0, %2 : vector<8x128xf32>
    %c0_2 = arith.constant 0 : index
    %4 = memref.load %arg2[%c0_2] : memref<2xf32, #tpu.memory_space<smem>>
    %c0_3 = arith.constant 0 : index
    %5 = memref.load %arg3[%c0_3] : memref<2xf32, #tpu.memory_space<smem>>
    %6 = arith.mulf %3, %3 : vector<8x128xf32>
    %7 = vector.broadcast %5 : f32 to vector<8x128xf32>
    %8 = arith.mulf %7, %6 : vector<8x128xf32>
    %9 = vector.broadcast %4 : f32 to vector<8x128xf32>
    %10 = arith.addf %9, %8 : vector<8x128xf32>
    %c1 = arith.constant 1 : index
    %11 = memref.load %arg4[%c1] : memref<2xf32, #tpu.memory_space<smem>>
    %12 = vector.broadcast %11 : f32 to vector<8x128xf32>
    %13 = arith.subf %0, %12 : vector<8x128xf32>
    %c1_4 = arith.constant 1 : index
    %14 = memref.load %arg2[%c1_4] : memref<2xf32, #tpu.memory_space<smem>>
    %c1_5 = arith.constant 1 : index
    %15 = memref.load %arg3[%c1_5] : memref<2xf32, #tpu.memory_space<smem>>
    %16 = arith.mulf %13, %13 : vector<8x128xf32>
    %17 = vector.broadcast %15 : f32 to vector<8x128xf32>
    %18 = arith.mulf %17, %16 : vector<8x128xf32>
    %19 = vector.broadcast %14 : f32 to vector<8x128xf32>
    %20 = arith.addf %19, %18 : vector<8x128xf32>
    %21 = arith.maximumf %10, %20 : vector<8x128xf32>
    %22 = arith.subf %10, %20 : vector<8x128xf32>
    %23 = math.absf %22 : vector<8x128xf32>
    %cst = arith.constant 0.000000e+00 : f32
    %24 = vector.broadcast %cst : f32 to vector<8x128xf32>
    %25 = arith.subf %24, %23 : vector<8x128xf32>
    %26 = math.exp %25 : vector<8x128xf32>
    %27 = math.log1p %26 : vector<8x128xf32>
    %28 = arith.addf %21, %27 : vector<8x128xf32>
    %c4_i32 = arith.constant 4 : i32
    %29 = arith.cmpi ne, %arg0, %c4_i32 : i32
    %30 = arith.extui %29 : i1 to i32
    %c0_i32 = arith.constant 0 : i32
    %31 = arith.cmpi ne, %30, %c0_i32 : i32
    scf.if %31 {
      %cst_8 = arith.constant dense<0.000000e+00> : vector<128xf32>
      %35 = vector.multi_reduction <add>, %28, %cst_8 [0] : vector<8x128xf32> to vector<128xf32>
      %36 = vector.shape_cast %35 : vector<128xf32> to vector<1x1x128xf32>
      %c0_9 = arith.constant 0 : index
      %c0_10 = arith.constant 0 : index
      %c0_11 = arith.constant 0 : index
      %37 = vector.load %arg5[%c0_9, %c0_10, %c0_11] : memref<1x1x128xf32, #tpu.memory_space<vmem>>, vector<1x1x128xf32>
      tpu.vector_store %arg5[%c0_9, %c0_10, %c0_11], %36 {strides = array<i32>} : memref<1x1x128xf32, #tpu.memory_space<vmem>>, vector<1x1x128xf32>,
    } else {
    }
    %c4_i32_6 = arith.constant 4 : i32
    %32 = arith.cmpi eq, %arg0, %c4_i32_6 : i32
    %33 = arith.extui %32 : i1 to i32
    %c0_i32_7 = arith.constant 0 : i32
    %34 = arith.cmpi ne, %33, %c0_i32_7 : i32
    scf.if %34 {
      %35 = tpu.iota {dimensions = array<i32: 0>} : vector<8x128xi32>
      %36 = tpu.iota {dimensions = array<i32: 1>} : vector<8x128xi32>
      %c128_i32 = arith.constant 128 : i32
      %37 = vector.broadcast %c128_i32 : i32 to vector<8x128xi32>
      %38 = arith.muli %35, %37 : vector<8x128xi32>
      %39 = arith.addi %38, %36 : vector<8x128xi32>
      %c3_i32 = arith.constant 3 : i32
      %40 = vector.broadcast %c3_i32 : i32 to vector<8x128xi32>
      %41 = arith.cmpi slt, %39, %40 : vector<8x128xi32>
      %cst_8 = arith.constant 0.000000e+00 : f32
      %42 = vector.broadcast %cst_8 : f32 to vector<8x128xf32>
      %43 = arith.select %41, %28, %42 : vector<8x128xi1>, vector<8x128xf32>
      %cst_9 = arith.constant dense<0.000000e+00> : vector<128xf32>
      %44 = vector.multi_reduction <add>, %43, %cst_9 [0] : vector<8x128xf32> to vector<128xf32>
      %45 = vector.shape_cast %44 : vector<128xf32> to vector<1x1x128xf32>
      %c0_10 = arith.constant 0 : index
      %c0_11 = arith.constant 0 : index
      %c0_12 = arith.constant 0 : index
      %46 = vector.load %arg5[%c0_10, %c0_11, %c0_12] : memref<1x1x128xf32, #tpu.memory_space<vmem>>, vector<1x1x128xf32>
      tpu.vector_store %arg5[%c0_10, %c0_11, %c0_12], %45 {strides = array<i32>} : memref<1x1x128xf32, #tpu.memory_space<vmem>>, vector<1x1x128xf32>,
    } else {
    }
    return
  }
  func.func @transform_0(%arg0: i32) -> (i32, i32) {
    %c0_i32 = arith.constant 0 : i32
    %c0_i32_0 = arith.constant 0 : i32
    return %arg0, %c0_i32 : i32, i32
  }
  func.func @transform_1(%arg0: i32) -> i32 {
    %c0_i32 = arith.constant 0 : i32
    %c0_i32_0 = arith.constant 0 : i32
    return %c0_i32 : i32
  }
  func.func @transform_2(%arg0: i32) -> i32 {
    %c0_i32 = arith.constant 0 : i32
    %c0_i32_0 = arith.constant 0 : i32
    return %c0_i32 : i32
  }
  func.func @transform_3(%arg0: i32) -> i32 {
    %c0_i32 = arith.constant 0 : i32
    %c0_i32_0 = arith.constant 0 : i32
    return %c0_i32 : i32
  }
  func.func @transform_4(%arg0: i32) -> (i32, i32, i32) {
    %c0_i32 = arith.constant 0 : i32
    %c0_i32_0 = arith.constant 0 : i32
    %c0_i32_1 = arith.constant 0 : i32
    return %arg0, %c0_i32, %c0_i32_0 : i32, i32, i32
  }
}

</mosaic_0001>

<bundles_post_ra>
// kernel: tpu_custom_call.1
= control target key start
LH: loop header
LB: loop body
LE: loop exit
PB: predicated region body
PF: predicated region fallthrough
CT: control target
= control target key end

     0   :  { %9 = vsyncpa [#allocation3], 0  ;;  %s922_s0 = inlined_call_operand.hbm [shape: f32[40,128], index: 0, kind: input, shape index: {}]   ;;  %s923_s1 = inlined_call_operand.vmem [shape: f32[2], index: 1, kind: input, shape index: {}]   ;;  %s924_s2 = inlined_call_operand.vmem [shape: f32[2], index: 2, kind: input, shape index: {}]   ;;  %s925_s3 = inlined_call_operand.vmem [shape: f32[2], index: 3, kind: input, shape index: {}]   ;;  %s926_s4 = inlined_call_operand.hbm [shape: f32[5,1,128], index: 4, kind: output, shape index: {}]  }
   0x1   :  { %11 = vsyncpa [#allocation3 + $0x1], 0 }
   0x2   :  { %12 = vsyncpa [#allocation5], 0 }
   0x3   :  { %13 = vsyncpa [#allocation8], 0 }
   0x4   :  { %14 = vsyncpa [#allocation4], 0 }
   0x5   :  { %16 = vsyncpa [#allocation4 + $0x1], 0  ;;  %s711_s15 = smov 0   ;;  %s713_s16 = smov 0  }
   0x6   :  { %s715_s17 = smov 0   ;;  %s717_s18 = smov 0  }
   0x7 LB: > { %s732_s19 = sadd.s32 4294967295, %s679_s18   ;;  %s428_s20 = sadd.s32 4294967294, %s679_s18   ;;  %s679_s18 = sphi %s717_s18, %s948_s18   ;;  %s675_s17 = sphi %s715_s17, %s947_s17   ;;  %s671_s16 = sphi %s713_s16, %s946_s16   ;;  %s667_s15 = sphi %s711_s15, %s945_s15  }
   0x8   : > { %p42_p0 = scmp.ne.s32.totalorder %s671_s16, %s667_s15  ;;  %p927_p1 = scmp.eq.s32.totalorder %s732_s19, 0 }
   0x9   : > { %p135_p3 = scmp.eq.s32.totalorder %s428_s20, 4  ;;  %p429_p5 = scmp.ge.s32.totalorder %s679_s18, 1 }
   0xa   : > { %p741_p4 = por %p927_p1, %p42_p0  ;;  %p142_p7 = scmp.lt.s32.totalorder %s679_s18, 6 }
   0xb   : > { %p746_p6 = por %p135_p3, %p42_p0  ;;  %s166_s25 = sshll.u32 %s924_s2, 4  ;;  %s167_s25 = int_to_ptr.vmem [resolvable:$true] %s166_s25 }
   0xc   : > { %s930_s21 = scalar_select %p741_p4, 1, 0 }
   0xd   : > { %s931_s22 = scalar_select %p746_p6, 1, 0 }
   0xe   : > { %p754_p8 = pnand %p429_p5, %p142_p7  ;;  %s155_s29 = sshll.u32 %s923_s1, 4  ;;  %s156_s29 = int_to_ptr.vmem [resolvable:$true] %s155_s29 }
   0xf   : > { %s177_s7 = sshll.u32 %s925_s3, 4  ;;  %s530_s8 = scalar_lea.vmem %s167_s25, 16  ;;  %s772_s7 = int_to_ptr.vmem [resolvable:$true] %s177_s7 }
  0x10   : > { %s932_s26 = scalar_select %p754_p8, 1, 0 }
  0x11   : > { %p465_p9 = pneg %p754_p8  ;;  %p531_p11 = scmp.ne.s32.totalorder %s167_s25, %s530_s8 }
  0x12   : > { %p538_p3 = scmp.lt.s32.totalorder %s167_s25, %s167_s25  ;;  %p539_p5 = scmp.lt.s32.totalorder %s530_s8, %s530_s8 }
  0x13   : > { %p765_p10 = pnand %p465_p9, %p927_p1 }
  0x14   : > { %p540_p7 = por %p539_p5, %p538_p3 }
  0x15   : > { %p532_p12 = pneg %p765_p10 }
  0x17   : > { %p533_p13 = pnand %p532_p12, %p531_p11 }
  0x19   : > { %p534_p0 = pneg %p533_p13 }
  0x1b   : > { %p541_p9 = pnand %p540_p7, %p534_p0 }
  0x1d   : > { %544 = shalt.err (!%p541_p9)
}
  0x1e   : > { %s681_s9 = smov [#allocation7]   ;;  %s545_s10 = scalar_lea.vmem %s156_s29, 16 }
  0x1f   : > { %471 = dma.vmem_to_smem (!%p765_p10), %s167_s25, 16, %s681_s9, [#allocation8]  }
  0x20   : > { %p546_p1 = scmp.ne.s32.totalorder %s156_s29, %s545_s10  ;;  %p553_p4 = scmp.lt.s32.totalorder %s156_s29, %s156_s29 }
  0x21   : > { %p554_p8 = scmp.lt.s32.totalorder %s545_s10, %s545_s10 }
  0x22   : > { %p548_p2 = pnand %p546_p1, %p532_p12 }
  0x23   : > { %p555_p11 = por %p554_p8, %p553_p4 }
  0x24   : > { %p549_p6 = pneg %p548_p2 }
  0x26   : > { %p556_p13 = pnand %p555_p11, %p549_p6 }
  0x28   : > { %559 = shalt.err (!%p556_p13)
}
  0x29   : > { %s682_s11 = smov [#allocation6]   ;;  %s560_s12 = scalar_lea.vmem %s772_s7, 16 }
  0x2a   : > { %468 = dma.vmem_to_smem (!%p765_p10), %s156_s29, 16, %s682_s11, [#allocation5]  }
  0x2b   : > { %p561_p0 = scmp.ne.s32.totalorder %s772_s7, %s560_s12  ;;  %p568_p2 = scmp.lt.s32.totalorder %s772_s7, %s772_s7 }
  0x2c   : > { %p569_p5 = scmp.lt.s32.totalorder %s560_s12, %s560_s12 }
  0x2d   : > { %p563_p3 = pnand %p561_p0, %p532_p12 }
  0x2e   : > { %p570_p4 = por %p569_p5, %p568_p2 }
  0x2f   : > { %p564_p1 = pneg %p563_p3 }
  0x31   : > { %p571_p6 = pnand %p570_p4, %p564_p1 }
  0x33   : > { %574 = shalt.err (!%p571_p6)
}
  0x34   : > { %s683_s13 = smov [#allocation9]   ;;  %s797_s14 = sadd.s32 1, %s679_s18  }
  0x35   : > { %474 = dma.vmem_to_smem (!%p765_p10), %s772_s7, 16, %s683_s13, [#allocation8]  }
  0x36   : > { %s26_s20 = ssub.s32 %s679_s18, %s797_s14  ;;  %s29_s23 = sadd.s32 1, %s675_s17 }
  0x37   : > { %p27_p8 = scmp.eq.s32.totalorder %s26_s20, 0  ;;  %p36_p12 = scmp.ne.s32.totalorder %s675_s17, %s671_s16 }
  0x38   : > { %p37_p7 = scmp.eq.s32.totalorder %s679_s18, 0  ;;  %p486_p9 = scmp.lt.s32.totalorder %s679_s18, 5 }
  0x39   : > { %s807_s24 = scalar_select %p27_p8, %s675_s17, %s29_s23  }
  0x3a   : > { %p38_p11 = por %p37_p7, %p36_p12  ;;  %p934_p13 = scmp.eq.s32.totalorder %s732_s19, 4 }
  0x3b   : > { %s188_s27 = sand.u32 1, %s675_s17   ;;  %s435_s28 = sshll.u32 %s679_s18, 7 }
  0x3c   : > { %p811_p0 = por %p934_p13, %p36_p12  ;;  %s434_s29 = sshll.u32 %s188_s27, 3 }
  0x3d   : > { %s820_s6 = scalar_lea.hbm %s922_s0, %s435_s28  ;;  %s192_s7 = scalar_lea.vmem [#allocation2], %s434_s29 }
  0x3e   : > { %s199_s8 = sshll.u32 %s192_s7, 4  ;;  %p822_p10 = pnand %p486_p9, %p38_p11  ;;  %s826_s8 = int_to_ptr.vmem [resolvable:$true] %s199_s8 }
  0x3f   : > { %s189_s10 = scalar_lea.sflag [#allocation3], %s188_s27  ;;  %s575_s11 = scalar_lea.hbm %s820_s6, 128 }
  0x40   : > { %p576_p3 = scmp.ne.s32.totalorder %s820_s6, %s575_s11  ;;  %p577_p1 = pneg %p822_p10 }
  0x41   : > { %s580_s20 = scalar_lea.hbm %s922_s0, 640  ;;  %p581_p4 = scmp.lt.u32.totalorder %s820_s6, %s922_s0 }
  0x42   : > { %p578_p2 = pnand %p577_p1, %p576_p3  ;;  %p582_p6 = scmp.lt.u32.totalorder %s580_s20, %s575_s11 }
  0x43   : > { %p584_p12 = scmp.lt.u32.totalorder %s575_s11, %s820_s6 }
  0x44   : > { %p579_p5 = pneg %p578_p2  ;;  %p583_p8 = por %p582_p6, %p581_p4 }
  0x46   : > { %p585_p7 = por %p584_p12, %p583_p8 }
  0x48   : > { %p586_p9 = pnand %p585_p7, %p579_p5 }
  0x4a   : > { %589 = shalt.err (!%p586_p9)
}
  0x4b   : > { %s590_s27 = scalar_lea.vmem %s826_s8, 128  ;;  %s684_s29 = smov [#allocation2]  }
  0x4c   : > { %p591_p11 = scmp.ne.s32.totalorder %s826_s8, %s590_s27  ;;  %s595_s30 = sshll.u32 %s684_s29, 4  ;;  %s596_s30 = int_to_ptr.vmem [resolvable:$false] %s595_s30 }
  0x4d   : > { %s597_s5 = scalar_lea.vmem %s596_s30, 256  ;;  %p598_p2 = scmp.lt.s32.totalorder %s826_s8, %s596_s30 }
  0x4e   : > { %p593_p13 = pnand %p591_p11, %p577_p1  ;;  %p599_p4 = scmp.lt.s32.totalorder %s597_s5, %s590_s27 }
  0x50   : > { %p594_p3 = pneg %p593_p13  ;;  %p600_p6 = por %p599_p4, %p598_p2 }
  0x52   : > { %p601_p8 = pnand %p600_p6, %p594_p3 }
  0x54   : > { %604 = shalt.err (!%p601_p8)
}
  0x55   : > { %478 = dma.hbm_to_vmem [thread:$0]  (!%p822_p10), %s820_s6, 128, %s826_s8, %s189_s10  }
  0x56   : > { %p937_p5 = scmp.ne.s32.totalorder %s932_s26, 0 }
  0x57   : > { %s856_s7 = sand.u32 (!%p937_p5), 1, %s671_s16   ;;  %p938_p1 = scmp.ne.s32.totalorder (!%p937_p5), %s930_s21, 0 }
  0x58   : > { %208 = sbr.rel (%p937_p5) target bundleno = 219 (0xdb), region = 36  ;;  %s437_s11 = sshll.u32 (!%p937_p5), %s856_s7, 3 }
  0x59   : > { %s211_s12 = scalar_lea.sflag (!%p937_p5), [#allocation3], %s856_s7  ;;  %s214_s13 = scalar_lea.vmem (!%p937_p5), [#allocation2], %s437_s11 }
  0x5f   : > { %650 = dma.done.wait (%p938_p1), %s211_s12, 128  }
  0x60   : > { %652 = vsyncadd (%p938_p1), %s211_s12, 4294967168  ;;  %p939_p12 = scmp.eq.s32.totalorder %s732_s19, 0 }
  0x62   : > { %654 = dma.done.wait (%p939_p12), [#allocation5], 16   ;;  %p940_p10 = pmov %p939_p12 }
  0x64   : > { %656 = vsyncadd (%p940_p10), [#allocation5], 4294967280  ;;  %p941_p7 = pmov %p940_p10 }
  0x66   : > { %658 = dma.done.wait (%p941_p7), [#allocation8], 32   ;;  %p942_p9 = pmov %p941_p7 }
  0x68   : > { %660 = vsyncadd (%p942_p9), [#allocation8], 4294967264 }
  0x69   : > { %231 = sfence }
  0x6a   : > { %s252_s26 = sld [smem:[#allocation9]]  ;;  %s441_s9 = sld [smem:[#allocation9 + $0x1]]  ;;  %v251_v0 = vld [vmem:[%s214_s13] sm:$0xff] }
  0x6b   : > { %s256_s6 = sld [smem:[#allocation7]]  ;;  %s443_s10 = sld [smem:[#allocation7 + $0x1]] }
  0x6c   : > { %s255_s8 = sld [smem:[#allocation6]]  ;;  %s442_s21 = sld [smem:[#allocation6 + $0x1]] }
  0x6d   : > { %s873_s20 = scalar_lea.vmem [#allocation10], %s856_s7  ;;  %p943_p11 = scmp.eq.s32.totalorder %s732_s19, 4 }
  0x70   : > { %v253_v1 = vstv %s252_s26  ;;  %v263_v4 = vstv %s441_s9 }
  0x71   : > { %v254_v2 = vsub.f32 %v251_v0, %v253_v1  ;;  %v258_v3 = vstv %s256_s6  ;;  %v264_v6 = vsub.f32 %v251_v0, %v263_v4  ;;  %v268_v8 = vstv %s443_s10 }
  0x72   : > { %v260_v7 = vstv %s255_s8  ;;  %v270_v11 = vstv %s442_s21 }
  0x73   : > { %v257_v5 = vmul.f32 %v254_v2, %v254_v2  ;;  %v267_v10 = vmul.f32 %v264_v6, %v264_v6 }
  0x75   : > { %v259_v9 = vmul.f32 %v258_v3, %v257_v5  ;;  %v269_v13 = vmul.f32 %v268_v8, %v267_v10 }
  0x77   : > { %v261_v12 = vadd.f32 %v260_v7, %v259_v9  ;;  %v271_v14 = vadd.f32 %v270_v11, %v269_v13 }
  0x79   : > { %v273_v15 = vsub.f32 %v261_v12, %v271_v14  ;;  %v272_v26 = vmax.f32 %v261_v12, %v271_v14 }
  0x7b   : > { %v274_v16 = vand.u32 2147483647, %v273_v15 }
  0x7d   : > { %v275_v17 = vsub.f32 0.0, %v274_v16 }
  0x7f   : > { %v276_v18 = vmul.f32 1.442695, %v275_v17 }
  0x81   : > { %526 = vpow2.f32 %v276_v18 }
  0x8b   : > { %v527_v19 = vpop.eup %526 }
  0x8c   : > { %v278_v20 = vadd.f32 1.0, %v527_v19  ;;  %v281_v21 = vmul.f32 -0.5, %v527_v19  ;;  %v284_v23 = vand.u32 2147483647, %v527_v19 }
  0x8e   : > { %528 = vlog2.f32 %v278_v20  ;;  %v282_v22 = vadd.f32 1.0, %v281_v21  ;;  %vm285_vm0 = vcmp.lt.f32.partialorder %v284_v23, 0.0004427343 }
  0x90   : > { %v283_v24 = vmul.f32 %v527_v19, %v282_v22 }
  0x96   : > { %291 = sbr.rel (%p943_p11) target bundleno = 171 (0xab), region = 56 }
  0x98   : > { %v529_v25 = vpop.eup %528 }
  0x99   : > { %v280_v27 = vmul.f32 0.6931472, %v529_v25 }
  0x9b   : > { %v286_v28 = vsel %vm285_vm0, %v283_v24, %v280_v27 }
  0x9c   : > { %v287_v29 = vadd.f32 %v286_v28, %v272_v26 }
  0x9e   : > { %v292_v30 = vrot.slane %v287_v29, 4 }
  0xa0   : > { %v293_v31 = vadd.f32 %v292_v30, %v287_v29 }
  0xa2   : > { %v294_v32 = vrot.slane %v293_v31, 2 }
  0xa4   : > { %v295_v33 = vadd.f32 %v294_v32, %v293_v31 }
  0xa6   : > { %v296_v34 = vrot.slane %v295_v33, 1 }
  0xa8   : > { %v297_v35 = vadd.f32 %v296_v34, %v295_v33 }
  0xaa   : > { %298 = vst [vmem:[%s873_s20] sm:$0x1] %v297_v35 }
  0xab PF: > { %p445_p13 = scmp.ne.s32.totalorder %s732_s19, 4 }
  0xac   : > { %v303_v36 = vlaneseq (!%p445_p13) }
  0xad   : > { %302 = sbr.rel (%p445_p13) target bundleno = 195 (0xc3), region = 60 }
  0xae   : > { %v304_v37 = vshrl.u32 (!%p445_p13), %v303_v36, 7  ;;  %v306_v38 = vand.u32 (!%p445_p13), 127, %v303_v36 }
  0xb0   : > { %v307_v39 = vmul.u32 (!%p445_p13), 128, %v304_v37 }
  0xb2   : > { %v308_v40 = vadd.s32 (!%p445_p13), %v307_v39, %v306_v38 }
  0xb4   : > { %vm309_vm1 = vcmp.lt.s32.totalorder %v308_v40, 3 }
  0xb5   : > { %v310_v41 = vsel %vm309_vm1, %v287_v29, 0.0 }
  0xb6   : > { %v311_v42 = vrot.slane %v310_v41, 4 }
  0xb8   : > { %v312_v43 = vadd.f32 %v311_v42, %v310_v41 }
  0xba   : > { %v313_v44 = vrot.slane %v312_v43, 2 }
  0xbc   : > { %v314_v45 = vadd.f32 %v313_v44, %v312_v43 }
  0xbe   : > { %v315_v46 = vrot.slane %v314_v45, 1 }
  0xc0   : > { %v316_v47 = vadd.f32 %v315_v46, %v314_v45 }
  0xc2   : > { %317 = vst [vmem:[%s873_s20] sm:$0x1] %v316_v47 }
  0xc3 PF: > { %s446_s23 = sshll.u32 %s732_s19, 4  ;;  %s331_s30 = sshll.u32 %s873_s20, 4  ;;  %s332_s30 = int_to_ptr.vmem [resolvable:$true] %s331_s30 }
  0xc4   : > { %s884_s29 = scalar_lea.hbm %s926_s4, %s446_s23  ;;  %s319_s5 = scalar_lea.sflag [#allocation4], %s856_s7 }
  0xc5   : > { %s605_s11 = scalar_lea.vmem %s332_s30, 16  ;;  %s685_s12 = smov [#allocation10]  }
  0xc6   : > { %p606_p3 = scmp.ne.s32.totalorder %s332_s30, %s605_s11  ;;  %s609_s13 = sshll.u32 %s685_s12, 4  ;;  %s610_s13 = int_to_ptr.vmem [resolvable:$false] %s609_s13 }
  0xc7   : > { %s611_s26 = scalar_lea.vmem %s610_s13, 32  ;;  %p612_p6 = scmp.lt.s32.totalorder %s332_s30, %s610_s13 }
  0xc8   : > { %p607_p2 = pnand %p606_p3, %p811_p0  ;;  %p613_p8 = scmp.lt.s32.totalorder %s611_s26, %s605_s11 }
  0xca   : > { %p608_p4 = pneg %p607_p2  ;;  %p614_p5 = por %p613_p8, %p612_p6 }
  0xcc   : > { %p615_p1 = pnand %p614_p5, %p608_p4 }
  0xce   : > { %618 = shalt.err (!%p615_p1)
}
  0xcf   : > { %s619_s19 = scalar_lea.hbm %s884_s29, 16  ;;  %s623_s8 = scalar_lea.hbm %s926_s4, 80 }
  0xd0   : > { %p620_p12 = scmp.ne.s32.totalorder %s884_s29, %s619_s19  ;;  %p624_p9 = scmp.lt.u32.totalorder %s884_s29, %s926_s4 }
  0xd1   : > { %p625_p11 = scmp.lt.u32.totalorder %s623_s8, %s619_s19  ;;  %p627_p3 = scmp.lt.u32.totalorder %s619_s19, %s884_s29 }
  0xd2   : > { %p621_p10 = pnand %p620_p12, %p811_p0 }
  0xd3   : > { %p626_p13 = por %p625_p11, %p624_p9 }
  0xd4   : > { %p622_p7 = pneg %p621_p10 }
  0xd5   : > { %p628_p2 = por %p627_p3, %p626_p13 }
  0xd7   : > { %p629_p4 = pnand %p628_p2, %p622_p7 }
  0xd9   : > { %632 = shalt.err (!%p629_p4)
}
  0xda   : > { %463 = dma.vmem_to_hbm [thread:$0]  (%p811_p0), %s332_s30, 16, %s884_s29, %s319_s5  }
  0xdb PF: > { %p490_p6 = scmp.ge.s32.totalorder %s679_s18, 2  ;;  %s343_s21 = sand.u32 1, %s667_s15  }
  0xdc   : > { %p944_p8 = scmp.ne.s32.totalorder %s931_s22, 0  ;;  %s344_s20 = scalar_lea.sflag [#allocation4], %s343_s21 }
  0xde   : > { %p480_p5 = pnand %p490_p6, %p944_p8 }
  0xe0   : > { %662 = dma.done.wait (!%p480_p5), %s344_s20, 16  }
  0xe1   : > { %664 = vsyncadd (!%p480_p5), %s344_s20, 4294967280  ;;  %p19_p1 = scmp.ge.s32.totalorder %s797_s14, 7   ;;  %s945_s15 = smov %s671_s16 }
  0xe2   : > { %s946_s16 = smov %s675_s17  ;;  %s947_s17 = smov %s807_s24 }
  0xe3   : > { %s948_s18 = smov %s797_s14  ;;  %21 = sbr.rel (!%p19_p1) target bundleno = 7 (0x7), region = 102 }
  0xea   :  { %348 = vsyncpa [#allocation3], 1 }
  0xeb   :  { %350 = vsyncpa [#allocation3 + $0x1], 1 }
  0xec   :  { %351 = vsyncpa [#allocation4], 1 }
  0xed   :  { %353 = vsyncpa [#allocation4 + $0x1], 1 }
  0xee   :  { %354 = vsyncpa [#allocation5], 1 }
  0xef   :  { %356 = vsyncpa [#allocation5 + $0x1], 1 }
  0xf0   :  { %357 = vsyncpa [#allocation8], 1 }

</bundles_post_ra>
